<compile_context>
chip_gen: v7x
topology: tpu7x:2x2x1
jax: 0.10.0
libtpu: 0.0.40
codegen_flags: <defaults>
</compile_context>

<pallas_src>
import jax
import jax.numpy as jnp
from jax.experimental import pallas as pl
from jax.experimental.pallas import tpu as pltpu

IN_FEATURES = 28 * 28        # 784 (contraction dim of fc1, no padding needed)
H1, H2 = 128, 64
OUT_FEATURES = 10
OUT_PAD = 128                # lane-dense output width (sliced back to 10 outside)
DEFAULT_TILE_B = 1024        # big batch tile to amortize per-step overhead


def _round_up(n, m):
    return (n + m - 1) // m * m


def _pick_batch_tile(B, max_tile):
    """Pick (padded_batch, tile_b).  Keeps >=2 grid steps for larger batches
    so the 'parallel' batch axis shards across both v7x TensorCores."""
    b8 = _round_up(max(B, 1), 8)
    if b8 <= 256:
        return b8, b8                                   # tiny batch: one step
    tb = min(max_tile, _round_up(pl.cdiv(b8, 2), 256))  # aim for >= 2 steps
    return _round_up(b8, tb), tb


def fcnn_kernel(x_ref, w1_ref, b1_ref, w2_ref, b2_ref, w3_ref, b3_ref, o_ref):
    # x tile: (tile_b, 784) bf16; weights bf16; biases f32; f32 accumulation.
    h1 = jnp.dot(x_ref[...], w1_ref[...], preferred_element_type=jnp.float32)
    h1 = jnp.maximum(h1 + b1_ref[...], 0.0)                       # (tb, 128) f32

    h2 = jnp.dot(h1.astype(jnp.bfloat16), w2_ref[...],
                 preferred_element_type=jnp.float32)
    h2 = jnp.maximum(h2 + b2_ref[...], 0.0)                       # (tb, 64) f32

    h3 = jnp.dot(h2.astype(jnp.bfloat16), w3_ref[...],
                 preferred_element_type=jnp.float32)
    o_ref[...] = (h3 + b3_ref[...]).astype(o_ref.dtype)           # (tb, 128) f32


def fcnn_forward(x, w1, b1, w2, b2, w3, b3, *, tile_b=DEFAULT_TILE_B):
    # Replicates x.view(-1, 28*28) from the PyTorch forward.
    x2d = x.reshape(-1, IN_FEATURES)
    B = x2d.shape[0]

    b_pad, tb = _pick_batch_tile(B, tile_b)

    # bf16 x: halves the dominant HBM stream; batch rows padded only if needed.
    x_bf = x2d.astype(jnp.bfloat16)
    if b_pad != B:
        x_p = jnp.zeros((b_pad, IN_FEATURES), jnp.bfloat16).at[:B, :].set(x_bf)
    else:
        x_p = x_bf

    # Weights -> bf16; only w3/b3 are padded (zero cols contribute nothing).
    w1_p = w1.astype(jnp.bfloat16)                                   # (784, 128)
    w2_p = w2.astype(jnp.bfloat16)                                   # (128, 64)
    w3_p = jnp.zeros((H2, OUT_PAD), jnp.bfloat16).at[:, :OUT_FEATURES].set(
        w3.astype(jnp.bfloat16))
    b1_p = b1.reshape(1, H1).astype(jnp.float32)
    b2_p = b2.reshape(1, H2).astype(jnp.float32)
    b3_p = jnp.zeros((1, OUT_PAD), jnp.float32).at[:, :OUT_FEATURES].set(
        b3.reshape(1, OUT_FEATURES).astype(jnp.float32))

    grid = (b_pad // tb,)
    pinned = lambda i: (0, 0)   # weights/biases: DMA'd once, VMEM-resident

    out = pl.pallas_call(
        fcnn_kernel,
        out_shape=jax.ShapeDtypeStruct((b_pad, OUT_PAD), jnp.float32),
        grid=grid,
        in_specs=[
            pl.BlockSpec((tb, IN_FEATURES), lambda i: (i, 0)),  # x tile (pipelined)
            pl.BlockSpec((IN_FEATURES, H1), pinned),            # w1
            pl.BlockSpec((1, H1), pinned),                      # b1
            pl.BlockSpec((H1, H2), pinned),                     # w2
            pl.BlockSpec((1, H2), pinned),                      # b2
            pl.BlockSpec((H2, OUT_PAD), pinned),                # w3 (N padded to 128)
            pl.BlockSpec((1, OUT_PAD), pinned),                 # b3 (padded)
        ],
        out_specs=pl.BlockSpec((tb, OUT_PAD), lambda i: (i, 0)),
        compiler_params=pltpu.CompilerParams(
            dimension_semantics=("parallel",)),                 # 2-TC sharding on v7x
    )(x_p, w1_p, b1_p, w2_p, b2_p, w3_p, b3_p)

    return out[:B, :OUT_FEATURES]


def init_params(key):
    # Deterministic init mimicking nn.Linear's uniform(-1/sqrt(in), 1/sqrt(in)).
    def linear(key, fan_in, fan_out):
        kw, kb = jax.random.split(key)
        bound = 1.0 / (fan_in ** 0.5)
        w = jax.random.uniform(kw, (fan_in, fan_out), jnp.float32, -bound, bound)
        b = jax.random.uniform(kb, (1, fan_out), jnp.float32, -bound, bound)
        return w, b

    k1, k2, k3 = jax.random.split(key, 3)
    w1, b1 = linear(k1, IN_FEATURES, H1)
    w2, b2 = linear(k2, H1, H2)
    w3, b3 = linear(k3, H2, OUT_FEATURES)
    return w1, b1, w2, b2, w3, b3


def ref_forward(x, w1, b1, w2, b2, w3, b3):
    # Plain-JAX reference mirroring the kernel math (bf16 operands, f32 accum).
    def dot_bf16(a, w):
        return jnp.dot(a.astype(jnp.bfloat16), w.astype(jnp.bfloat16),
                       preferred_element_type=jnp.float32)

    xf = x.reshape(-1, IN_FEATURES)
    h = jnp.maximum(dot_bf16(xf, w1) + b1, 0.0)
    h = jnp.maximum(dot_bf16(h, w2) + b2, 0.0)
    return dot_bf16(h, w3) + b3


if __name__ == "__main__":
    key = jax.random.PRNGKey(0)
    kx, kp = jax.random.split(key)

    # Small MNIST-like batch: (B, 1, 28, 28) NCHW; forward flattens to (B, 784).
    B = 8
    x = jax.random.normal(kx, (B, 1, 28, 28), dtype=jnp.float32)
    params = init_params(kp)

    out = fcnn_forward(x, *params)
    jax.block_until_ready(out)

    ref = ref_forward(x, *params)
    assert out.shape == (B, OUT_FEATURES)
    assert jnp.allclose(out, ref, atol=2e-2, rtol=2e-2), (
        float(jnp.max(jnp.abs(out - ref))))

    print("KERNEL_OK")
</pallas_src>

<mosaic_0001>
module attributes {stable_mosaic.version = 11 : i64} {
  func.func @fcnn_kernel(%arg0: i32, %arg1: memref<8x784xbf16, #tpu.memory_space<vmem>>, %arg2: memref<784x128xbf16, #tpu.memory_space<vmem>>, %arg3: memref<1x128xf32, #tpu.memory_space<vmem>>, %arg4: memref<128x64xbf16, #tpu.memory_space<vmem>>, %arg5: memref<1x64xf32, #tpu.memory_space<vmem>>, %arg6: memref<64x128xbf16, #tpu.memory_space<vmem>>, %arg7: memref<1x128xf32, #tpu.memory_space<vmem>>, %arg8: memref<8x128xf32, #tpu.memory_space<vmem>>) attributes {dimension_semantics = [#tpu.dimension_semantics<parallel>], iteration_bounds = array<i64: 1>, scalar_prefetch = 0 : i64, scratch_operands = 0 : i64, tpu.core_type = #tpu.core_type<tc>, window_params = [{transform_indices = @transform_0, window_bounds = array<i64: 8, 784>}, {pipeline_mode = #tpu.pipeline_mode<synchronous>, transform_indices = @transform_1, window_bounds = array<i64: 784, 128>}, {pipeline_mode = #tpu.pipeline_mode<synchronous>, transform_indices = @transform_2, window_bounds = array<i64: 1, 128>}, {pipeline_mode = #tpu.pipeline_mode<synchronous>, transform_indices = @transform_3, window_bounds = array<i64: 128, 64>}, {pipeline_mode = #tpu.pipeline_mode<synchronous>, transform_indices = @transform_4, window_bounds = array<i64: 1, 64>}, {pipeline_mode = #tpu.pipeline_mode<synchronous>, transform_indices = @transform_5, window_bounds = array<i64: 64, 128>}, {pipeline_mode = #tpu.pipeline_mode<synchronous>, transform_indices = @transform_6, window_bounds = array<i64: 1, 128>}, {transform_indices = @transform_7, window_bounds = array<i64: 8, 128>}]} {
    %c0 = arith.constant 0 : index
    %c0_0 = arith.constant 0 : index
    %0 = vector.load %arg1[%c0, %c0_0] : memref<8x784xbf16, #tpu.memory_space<vmem>>, vector<8x784xbf16>
    %c0_1 = arith.constant 0 : index
    %c0_2 = arith.constant 0 : index
    %1 = vector.load %arg2[%c0_1, %c0_2] : memref<784x128xbf16, #tpu.memory_space<vmem>>, vector<784x128xbf16>
    %cst = arith.constant dense<0.000000e+00> : vector<8x128xf32>
    %2 = tpu.matmul %0, %1, %cst {dimension_numbers = #tpu.dot_dimension_numbers<[1], [0], [0], [1], [0, 0, 1, 1], [], []>} : vector<8x784xbf16>, vector<784x128xbf16>, vector<8x128xf32> -> vector<8x128xf32>
    %c0_3 = arith.constant 0 : index
    %c0_4 = arith.constant 0 : index
    %3 = vector.load %arg3[%c0_3, %c0_4] : memref<1x128xf32, #tpu.memory_space<vmem>>, vector<1x128xf32>
    %4 = vector.broadcast %3 : vector<1x128xf32> to vector<8x128xf32>
    %5 = arith.addf %2, %4 : vector<8x128xf32>
    %cst_5 = arith.constant 0.000000e+00 : f32
    %6 = vector.broadcast %cst_5 : f32 to vector<8x128xf32>
    %7 = arith.maximumf %5, %6 : vector<8x128xf32>
    %8 = arith.truncf %7 : vector<8x128xf32> to vector<8x128xbf16>
    %c0_6 = arith.constant 0 : index
    %c0_7 = arith.constant 0 : index
    %9 = vector.load %arg4[%c0_6, %c0_7] : memref<128x64xbf16, #tpu.memory_space<vmem>>, vector<128x64xbf16>
    %cst_8 = arith.constant dense<0.000000e+00> : vector<8x64xf32>
    %10 = tpu.matmul %8, %9, %cst_8 {dimension_numbers = #tpu.dot_dimension_numbers<[1], [0], [0], [1], [0, 0, 1, 1], [], []>} : vector<8x128xbf16>, vector<128x64xbf16>, vector<8x64xf32> -> vector<8x64xf32>
    %c0_9 = arith.constant 0 : index
    %c0_10 = arith.constant 0 : index
    %11 = vector.load %arg5[%c0_9, %c0_10] : memref<1x64xf32, #tpu.memory_space<vmem>>, vector<1x64xf32>
    %12 = vector.broadcast %11 : vector<1x64xf32> to vector<8x64xf32>
    %13 = arith.addf %10, %12 : vector<8x64xf32>
    %cst_11 = arith.constant 0.000000e+00 : f32
    %14 = vector.broadcast %cst_11 : f32 to vector<8x64xf32>
    %15 = arith.maximumf %13, %14 : vector<8x64xf32>
    %16 = arith.truncf %15 : vector<8x64xf32> to vector<8x64xbf16>
    %c0_12 = arith.constant 0 : index
    %c0_13 = arith.constant 0 : index
    %17 = vector.load %arg6[%c0_12, %c0_13] : memref<64x128xbf16, #tpu.memory_space<vmem>>, vector<64x128xbf16>
    %cst_14 = arith.constant dense<0.000000e+00> : vector<8x128xf32>
    %18 = tpu.matmul %16, %17, %cst_14 {dimension_numbers = #tpu.dot_dimension_numbers<[1], [0], [0], [1], [0, 0, 1, 1], [], []>} : vector<8x64xbf16>, vector<64x128xbf16>, vector<8x128xf32> -> vector<8x128xf32>
    %c0_15 = arith.constant 0 : index
    %c0_16 = arith.constant 0 : index
    %19 = vector.load %arg7[%c0_15, %c0_16] : memref<1x128xf32, #tpu.memory_space<vmem>>, vector<1x128xf32>
    %20 = vector.broadcast %19 : vector<1x128xf32> to vector<8x128xf32>
    %21 = arith.addf %18, %20 : vector<8x128xf32>
    %c0_17 = arith.constant 0 : index
    %c0_18 = arith.constant 0 : index
    %22 = vector.load %arg8[%c0_17, %c0_18] : memref<8x128xf32, #tpu.memory_space<vmem>>, vector<8x128xf32>
    tpu.vector_store %arg8[%c0_17, %c0_18], %21 {strides = array<i32>} : memref<8x128xf32, #tpu.memory_space<vmem>>, vector<8x128xf32>,
    return
  }
  func.func @transform_0(%arg0: i32) -> (i32, i32) {
    %c0_i32 = arith.constant 0 : i32
    %c0_i32_0 = arith.constant 0 : i32
    return %arg0, %c0_i32 : i32, i32
  }
  func.func @transform_1(%arg0: i32) -> (i32, i32) {
    %c0_i32 = arith.constant 0 : i32
    %c0_i32_0 = arith.constant 0 : i32
    %c0_i32_1 = arith.constant 0 : i32
    return %c0_i32, %c0_i32_0 : i32, i32
  }
  func.func @transform_2(%arg0: i32) -> (i32, i32) {
    %c0_i32 = arith.constant 0 : i32
    %c0_i32_0 = arith.constant 0 : i32
    %c0_i32_1 = arith.constant 0 : i32
    return %c0_i32, %c0_i32_0 : i32, i32
  }
  func.func @transform_3(%arg0: i32) -> (i32, i32) {
    %c0_i32 = arith.constant 0 : i32
    %c0_i32_0 = arith.constant 0 : i32
    %c0_i32_1 = arith.constant 0 : i32
    return %c0_i32, %c0_i32_0 : i32, i32
  }
  func.func @transform_4(%arg0: i32) -> (i32, i32) {
    %c0_i32 = arith.constant 0 : i32
    %c0_i32_0 = arith.constant 0 : i32
    %c0_i32_1 = arith.constant 0 : i32
    return %c0_i32, %c0_i32_0 : i32, i32
  }
  func.func @transform_5(%arg0: i32) -> (i32, i32) {
    %c0_i32 = arith.constant 0 : i32
    %c0_i32_0 = arith.constant 0 : i32
    %c0_i32_1 = arith.constant 0 : i32
    return %c0_i32, %c0_i32_0 : i32, i32
  }
  func.func @transform_6(%arg0: i32) -> (i32, i32) {
    %c0_i32 = arith.constant 0 : i32
    %c0_i32_0 = arith.constant 0 : i32
    %c0_i32_1 = arith.constant 0 : i32
    return %c0_i32, %c0_i32_0 : i32, i32
  }
  func.func @transform_7(%arg0: i32) -> (i32, i32) {
    %c0_i32 = arith.constant 0 : i32
    %c0_i32_0 = arith.constant 0 : i32
    return %arg0, %c0_i32 : i32, i32
  }
}

</mosaic_0001>

<bundles_post_ra>
// kernel: tpu_custom_call.1
= control target key start
LH: loop header
LB: loop body
LE: loop exit
PB: predicated region body
PF: predicated region fallthrough
CT: control target
= control target key end

     0   :  { %12 = vsyncpa [#allocation3], 0  ;;  %s1308_s0 = inlined_call_operand.vmem [shape: bf16[8,784], index: 0, kind: input, shape index: {}]   ;;  %s1309_s1 = inlined_call_operand.hbm [shape: bf16[784,128], index: 1, kind: input, shape index: {}]   ;;  %s1310_s2 = inlined_call_operand.vmem [shape: f32[1,128], index: 2, kind: input, shape index: {}]   ;;  %s1311_s3 = inlined_call_operand.vmem [shape: bf16[128,64], index: 3, kind: input, shape index: {}]   ;;  %s1312_s4 = inlined_call_operand.vmem [shape: f32[1,64], index: 4, kind: input, shape index: {}]   ;;  %s1313_s5 = inlined_call_operand.vmem [shape: bf16[64,128], index: 5, kind: input, shape index: {}]   ;;  %s1314_s6 = inlined_call_operand.vmem [shape: f32[1,128], index: 6, kind: input, shape index: {}]   ;;  %s1315_s7 = inlined_call_operand.hbm [shape: f32[8,128], index: 7, kind: output, shape index: {}]  }
   0x1   :  { %13 = vsyncpa [#allocation4], 0  ;;  %s1162_s24 = smov [#allocation2]   ;;  %s1114_s28 = scalar_lea.hbm %s1309_s1, 6272 }
   0x2   :  { %s21_s25 = sshll.u32 %s1162_s24, 4  ;;  %p1115_p0 = scmp.ne.s32.totalorder %s1309_s1, %s1114_s28  ;;  %s22_s25 = int_to_ptr.vmem [resolvable:$true] %s21_s25 }
   0x3   :  { %p1118_p1 = scmp.lt.u32.totalorder %s1114_s28, %s1309_s1 }
   0x5   :  { %p1120_p2 = pnand %p1118_p1, %p1115_p0 }
   0x7   :  { %1123 = shalt.err (!%p1120_p2)
}
   0x8   :  { %s1124_s10 = scalar_lea.vmem %s22_s25, 6272  ;;  %p1129_p4 = scmp.lt.s32.totalorder %s22_s25, %s22_s25 }
   0x9   :  { %p1125_p3 = scmp.ne.s32.totalorder %s22_s25, %s1124_s10  ;;  %p1130_p5 = scmp.lt.s32.totalorder %s1124_s10, %s1124_s10 }
   0xb   :  { %p1131_p6 = por %p1130_p5, %p1129_p4 }
   0xd   :  { %p1132_p7 = pnand %p1131_p6, %p1125_p3 }
   0xf   :  { %1135 = shalt.err (!%p1132_p7)
}
  0x10   :  { %s1163_s11 = smov 64   ;;  %s1164_s12 = smov 4  }
  0x11   :  { %27 = dma.hbm_to_vmem [thread:$0]  %s1309_s1, 6272, %s22_s25, [#allocation3], %s1163_s11, %s1163_s11, %s1164_s12  }
  0x12   :  { %1158 = dma.done.wait [#allocation3], 6272  }
  0x13   :  { %1159 = vsyncadd [#allocation3], 4294961024  ;;  %v1046_v0 = vld [vmem:[#allocation2 + $0x40] sm:$0xff]   ;;  %v1050_v4 = vld [vmem:[#allocation2 + $0x48] sm:$0xff]   ;;  %v1165_v43 = vmov 0.0   ;;  %vm1166_vm0 = vmmov 0  }
  0x14   :  { %v1047_v1 = vld [vmem:[#allocation2] sm:$0xff]   ;;  %920 = vmatprep.subr.bf16.mxu0 %v1046_v0  ;;  %v1051_v5 = vld [vmem:[#allocation2 + $0x8] sm:$0xff]   ;;  %v1054_v8 = vld [vmem:[#allocation2 + $0x50] sm:$0xff]   ;;  %vm469_vm1 = vcmask 130048   ;;  %vm787_vm2 = vcmask 523264   ;;  %s1167_s24 = smov [#allocation5]  }
  0x15   :  { %v1048_v2 = vld [vmem:[#allocation2 + $0xc0] sm:$0xff]   ;;  %921 = vmatpush3.bf16.msra.mxu0 %v1047_v1  ;;  %v1052_v6 = vld [vmem:[#allocation2 + $0xc8] sm:$0xff]   ;;  %v1055_v9 = vld [vmem:[#allocation2 + $0x10] sm:$0xff]  }
  0x16   :  { %v1049_v3 = vld [vmem:[#allocation2 + $0x80] sm:$0xff]   ;;  %942 = vmatprep.subr.bf16.mxu1 %v1048_v2  ;;  %922 = vmatprep.subr.bf16.mxu0 %v1050_v4  ;;  %v1053_v7 = vld [vmem:[#allocation2 + $0x88] sm:$0xff]   ;;  %v1056_v10 = vld [vmem:[#allocation2 + $0xd0] sm:$0xff]  }
  0x17   :  { %943 = vmatpush3.bf16.msra.mxu1 %v1049_v3  ;;  %v1057_v11 = vld [vmem:[#allocation2 + $0x90] sm:$0xff]   ;;  %v1058_v12 = vld [vmem:[#allocation2 + $0x58] sm:$0xff]   ;;  %v1062_v16 = vld [vmem:[#allocation2 + $0x60] sm:$0xff]  }
  0x18   :  { %944 = vmatprep.subr.bf16.mxu1 %v1052_v6  ;;  %v1059_v13 = vld [vmem:[#allocation2 + $0x18] sm:$0xff]   ;;  %v1063_v17 = vld [vmem:[#allocation2 + $0x20] sm:$0xff]   ;;  %v1066_v20 = vld [vmem:[#allocation2 + $0x68] sm:$0xff]  }
  0x19   :  { %923 = vmatpush3.bf16.msra.mxu0 %v1051_v5  ;;  %v1060_v14 = vld [vmem:[#allocation2 + $0xd8] sm:$0xff]   ;;  %v1064_v18 = vld [vmem:[#allocation2 + $0xe0] sm:$0xff]   ;;  %v1067_v21 = vld [vmem:[#allocation2 + $0x28] sm:$0xff]  }
  0x1a   :  { %924 = vmatprep.subr.bf16.mxu0 %v1054_v8  ;;  %v1061_v15 = vld [vmem:[#allocation2 + $0x98] sm:$0xff]   ;;  %v1065_v19 = vld [vmem:[#allocation2 + $0xa0] sm:$0xff]   ;;  %v1068_v22 = vld [vmem:[#allocation2 + $0xe8] sm:$0xff]  }
  0x1b   :  { %945 = vmatpush3.bf16.msra.mxu1 %v1053_v7  ;;  %v1069_v23 = vld [vmem:[#allocation2 + $0xa8] sm:$0xff]   ;;  %v1070_v24 = vld [vmem:[#allocation2 + $0x70] sm:$0xff]   ;;  %v1074_v28 = vld [vmem:[#allocation2 + $0x78] sm:$0xff]  }
  0x1c   :  { %946 = vmatprep.subr.bf16.mxu1 %v1056_v10  ;;  %v1071_v25 = vld [vmem:[#allocation2 + $0x30] sm:$0xff]   ;;  %v1075_v29 = vld [vmem:[#allocation2 + $0x38] sm:$0xff]   ;;  %v42_v31 = vld [vmem:[%s1308_s0] sm:$0xff] }
  0x1d   :  { %925 = vmatpush3.bf16.msra.mxu0 %v1055_v9  ;;  %v1072_v26 = vld [vmem:[#allocation2 + $0xf0] sm:$0xff]   ;;  %v1076_v30 = vld [vmem:[#allocation2 + $0xf8] sm:$0xff]   ;;  %v848_v32 = vcombine.low %v42_v31, %v42_v31  ;;  %v849_v33 = vcombine.high %v42_v31, %v42_v31  ;;  %v1080_v35 = vld [vmem:[#allocation2 + $0x140] sm:$0xff]  }
  0x1e   :  { %926 = vmatprep.subr.bf16.mxu0 %v1058_v12  ;;  %v1073_v27 = vld [vmem:[#allocation2 + $0xb0] sm:$0xff]   ;;  %v1079_v34 = vld [vmem:[#allocation2 + $0xb8] sm:$0xff]   ;;  %v43_v36 = vld [vmem:[%s1308_s0 + $0x8] sm:$0xff] }
  0x1f   :  { %947 = vmatpush3.bf16.msra.mxu1 %v1057_v11  ;;  %505 = vmatprep.mubr.bf16.mxu0 %v849_v33  ;;  %v850_v37 = vcombine.low %v43_v36, %v43_v36  ;;  %v851_v38 = vcombine.high %v43_v36, %v43_v36  ;;  %v1083_v39 = vld [vmem:[#allocation2 + $0x100] sm:$0xff]   ;;  %v1084_v40 = vld [vmem:[#allocation2 + $0x148] sm:$0xff]   ;;  %v1086_v42 = vld [vmem:[#allocation2 + $0x150] sm:$0xff]  }
  0x20   :  { %948 = vmatprep.subr.bf16.mxu1 %v1060_v14  ;;  %v1085_v41 = vld [vmem:[#allocation2 + $0x108] sm:$0xff]   ;;  %v1087_v44 = vld [vmem:[#allocation2 + $0x110] sm:$0xff]   ;;  %v1088_v45 = vld [vmem:[#allocation2 + $0x158] sm:$0xff]  }
  0x21   :  { %927 = vmatpush3.bf16.msra.mxu0 %v1059_v13  ;;  %545 = vmatprep.mubr.bf16.mxu1 %v851_v38  ;;  %v1089_v46 = vld [vmem:[#allocation2 + $0x118] sm:$0xff]   ;;  %v1090_v47 = vld [vmem:[#allocation2 + $0x160] sm:$0xff]   ;;  %v1092_v49 = vld [vmem:[#allocation2 + $0x168] sm:$0xff]  }
  0x22   :  { %928 = vmatprep.subr.bf16.mxu0 %v1062_v16  ;;  %v1091_v48 = vld [vmem:[#allocation2 + $0x120] sm:$0xff]   ;;  %v44_v51 = vld [vmem:[%s1308_s0 + $0x10] sm:$0xff]  ;;  %v1093_v52 = vld [vmem:[#allocation2 + $0x128] sm:$0xff]  }
  0x23   :  { %949 = vmatpush3.bf16.msra.mxu1 %v1061_v15  ;;  %v1098_v50 = vld [vmem:[#allocation2 + $0x180] sm:$0xff]   ;;  %v853_v53 = vcombine.high %v44_v51, %v44_v51  ;;  %v1101_v54 = vld [vmem:[%s1308_s0 + $0x18] ss:$0 sps:$4 sm:$0xff]   ;;  %v1094_v55 = vld [vmem:[#allocation2 + $0x170] sm:$0xff]   ;;  %v852_v59 = vcombine.low %v44_v51, %v44_v51 }
  0x24   :  { %950 = vmatprep.subr.bf16.mxu1 %v1064_v18  ;;  %v1095_v56 = vld [vmem:[#allocation2 + $0x130] sm:$0xff]   ;;  %v1096_v57 = vld [vmem:[#allocation2 + $0x178] sm:$0xff]   ;;  %v1102_v60 = vld [vmem:[%s1311_s3] sm:$0xff]  }
  0x25   :  { %929 = vmatpush3.bf16.msra.mxu0 %v1063_v17  ;;  %v1097_v58 = vld [vmem:[#allocation2 + $0x138] sm:$0xff]   ;;  %v1103_v61 = vld [vmem:[%s1311_s3 + $0x8] sm:$0xff]   ;;  %v1104_v62 = vld [vmem:[%s1311_s3 + $0x10] sm:$0xff]  }
  0x26   :  { %930 = vmatprep.subr.bf16.mxu0 %v1066_v20  ;;  %v1105_v63 = vld [vmem:[%s1311_s3 + $0x18] sm:$0xff]   ;;  %v1106_v0 = vld [vmem:[%s1311_s3 + $0x20] sm:$0xff]   ;;  %v1107_v1 = vld [vmem:[%s1311_s3 + $0x28] sm:$0xff]  }
  0x27   :  { %951 = vmatpush3.bf16.msra.mxu1 %v1065_v19  ;;  %v1108_v2 = vld [vmem:[%s1311_s3 + $0x30] sm:$0xff]   ;;  %v1109_v3 = vld [vmem:[%s1311_s3 + $0x38] sm:$0xff]   ;;  %v1110_v4 = vld [vmem:[%s1313_s5] sm:$0xff]  }
  0x28   :  { %952 = vmatprep.subr.bf16.mxu1 %v1068_v22  ;;  %v1111_v5 = vld [vmem:[%s1313_s5 + $0x8] sm:$0xff]   ;;  %v847_v7 = vld [vmem:[%s1310_s2] ss:$0 sm:$0xff]  ;;  %v1113_v33 = vld [vmem:[%s1313_s5 + $0x18] sm:$0xff]  }
  0x29   :  { %931 = vmatpush3.bf16.msra.mxu0 %v1067_v21 }
  0x2a   :  { %932 = vmatprep.subr.bf16.mxu0 %v1070_v24 }
  0x2b   :  { %953 = vmatpush3.bf16.msra.mxu1 %v1069_v23 }
  0x2c   :  { %954 = vmatprep.subr.bf16.mxu1 %v1072_v26 }
  0x2d   :  { %933 = vmatpush3.bf16.msra.mxu0 %v1071_v25 }
  0x2e   :  { %934 = vmatprep.subr.bf16.mxu0 %v1074_v28 }
  0x2f   :  { %955 = vmatpush3.bf16.msra.mxu1 %v1073_v27 }
  0x30   :  { %956 = vmatprep.subr.bf16.mxu1 %v1076_v30 }
  0x31   :  { %935 = vmatpush3.bf16.msra.mxu0 %v1075_v29 }
  0x32   :  { %964 = vmatprep.subr.bf16.mxu0 %v1080_v35 }
  0x33   :  { %957 = vmatpush3.bf16.msra.mxu1 %v1079_v34  ;;  %v905_v34 = vld [vmem:[%s1312_s4] ss:$0 sm:$0xff] }
  0x34   :  { %506 = vmatmul.mubr.bf16.vlgmr.msra.gmra.mrb[0].mxu0 %v848_v32  ;;  %1002 = vmatprep.subr.bf16.mxu1 %v1165_v43  ;;  %v1112_v32 = vld [vmem:[%s1313_s5 + $0x10] sm:$0xff]   ;;  %s838_s5 = sshll.u32 %s1167_s24, 4  ;;  %s839_s5 = int_to_ptr.vmem [resolvable:$true] %s838_s5 }
  0x35   :  { %965 = vmatpush3.bf16.msra.mxu0 %v1083_v39  ;;  %585 = vmatprep.mubr.bf16.mxu0 %v853_v53  ;;  %s1136_s4 = scalar_lea.vmem %s839_s5, 128  ;;  %p1141_p9 = scmp.lt.s32.totalorder %s839_s5, %s839_s5 }
  0x36   :  { %546 = vmatmul.mubr.bf16.vlgmr.msra.gmra.mrb[0].mxu1 %v850_v37  ;;  %966 = vmatprep.subr.bf16.mxu0 %v1084_v40  ;;  %p1137_p8 = scmp.ne.s32.totalorder %s839_s5, %s1136_s4  ;;  %p1142_p10 = scmp.lt.s32.totalorder %s1136_s4, %s1136_s4 }
  0x37   :  { %1004 = vmatprep.mubr.msk.bf16.mxu1 %vm1166_vm0, %v1165_v43  ;;  %1003 = vmatpush3.bf16.msra.mxu1 %v1098_v50 }
  0x38   :  { %1008 = vmatprep.subr.bf16.mxu1 %v1165_v43  ;;  %p1143_p11 = por %p1142_p10, %p1141_p9 }
  0x39   :  { %967 = vmatpush3.bf16.msra.mxu0 %v1085_v41 }
  0x3a   :  { %968 = vmatprep.subr.bf16.mxu0 %v1086_v42  ;;  %v914_v42 = vld [vmem:[%s1314_s6] ss:$0 sm:$0xff]  ;;  %p1144_p12 = pnand %p1143_p11, %p1137_p8 }
  0x3d   :  { %969 = vmatpush3.bf16.msra.mxu0 %v1087_v44 }
  0x3e   :  { %970 = vmatprep.subr.bf16.mxu0 %v1088_v45  ;;  %1005 = vmatmul.mubr.msk.bf16.vlgmr.msra.gmra.mrb[4].mxu1 %vm469_vm1, %v1101_v54 }
  0x3f   :  { %1024 = vmatprep.mubr.msk.bf16.mxu1 %vm1166_vm0, %v1165_v43  ;;  %1009 = vmatpush3.bf16.msra.mxu1 %v1102_v60 }
  0x40   :  { %1010 = vmatprep.subr.bf16.mxu1 %v1165_v43 }
  0x41   :  { %971 = vmatpush3.bf16.msra.mxu0 %v1089_v46 }
  0x42   :  { %972 = vmatprep.subr.bf16.mxu0 %v1090_v47 }
  0x43   :  { %1011 = vmatpush3.bf16.msra.mxu1 %v1103_v61 }
  0x44   :  { %1012 = vmatprep.subr.bf16.mxu1 %v1165_v43 }
  0x45   :  { %973 = vmatpush3.bf16.msra.mxu0 %v1091_v48 }
  0x46   :  { %974 = vmatprep.subr.bf16.mxu0 %v1092_v49 }
  0x47   :  { %1013 = vmatpush3.bf16.msra.mxu1 %v1104_v62 }
  0x48   :  { %1014 = vmatprep.subr.bf16.mxu1 %v1165_v43 }
  0x49   :  { %975 = vmatpush3.bf16.msra.mxu0 %v1093_v52 }
  0x4a   :  { %976 = vmatprep.subr.bf16.mxu0 %v1094_v55 }
  0x4b   :  { %1015 = vmatpush3.bf16.msra.mxu1 %v1105_v63 }
  0x4c   :  { %1016 = vmatprep.subr.bf16.mxu1 %v1165_v43 }
  0x4d   :  { %977 = vmatpush3.bf16.msra.mxu0 %v1095_v56 }
  0x4e   :  { %978 = vmatprep.subr.bf16.mxu0 %v1096_v57 }
  0x4f   :  { %1017 = vmatpush3.bf16.msra.mxu1 %v1106_v0 }
  0x50   :  { %1018 = vmatprep.subr.bf16.mxu1 %v1165_v43 }
  0x51   :  { %979 = vmatpush3.bf16.msra.mxu0 %v1097_v58 }
  0x52   :  { %1028 = vmatprep.subr.bf16.mxu0 %v1165_v43 }
  0x53   :  { %1019 = vmatpush3.bf16.msra.mxu1 %v1107_v1 }
  0x54   :  { %586 = vmatmul.mubr.bf16.vlgmr.msra.gmra.mrb[4].mxu0 %v852_v59  ;;  %1020 = vmatprep.subr.bf16.mxu1 %v1165_v43 }
  0x55   :  { %1036 = vmatprep.mubr.msk.bf16.mxu0 %vm1166_vm0, %v1165_v43  ;;  %1029 = vmatpush3.bf16.msra.mxu0 %v1110_v4 }
  0x56   :  { %1030 = vmatprep.subr.bf16.mxu0 %v1165_v43 }
  0x57   :  { %1021 = vmatpush3.bf16.msra.mxu1 %v1108_v2 }
  0x58   :  { %1022 = vmatprep.subr.bf16.mxu1 %v1165_v43 }
  0x59   :  { %1031 = vmatpush3.bf16.msra.mxu0 %v1111_v5 }
  0x5a   :  { %1032 = vmatprep.subr.bf16.mxu0 %v1165_v43 }
  0x5b   :  { %1023 = vmatpush3.bf16.msra.mxu1 %v1109_v3 }
  0x5d   :  { %1033 = vmatpush3.bf16.msra.mxu0 %v1112_v32 }
  0x5e   :  { %1034 = vmatprep.subr.bf16.mxu0 %v1165_v43 }
  0x61   :  { %1035 = vmatpush3.bf16.msra.mxu0 %v1113_v33 }
 0x107   :  { %v936_v6 = vpop.f32.mrb[0].mxu0 }
 0x108   :  { %v937_v8 = vpop.f32.mrb[1].mxu0 }
 0x109   :  { %v938_v9 = vadd.f32 %v937_v8, %v936_v6  ;;  %v939_v10 = vpop.f32.mrb[2].mxu0  ;;  %v958_v11 = vpop.f32.mrb[0].mxu1 }
 0x10a   :  { %v940_v12 = vpop.f32.mrb[3].mxu0  ;;  %v959_v13 = vpop.f32.mrb[1].mxu1 }
 0x10b   :  { %v508_v14 = vadd.f32 %v938_v9, %v847_v7  ;;  %v960_v15 = vadd.f32 %v959_v13, %v958_v11  ;;  %v961_v16 = vpop.f32.mrb[2].mxu1 }
 0x10c   :  { %v962_v17 = vpop.f32.mrb[3].mxu1 }
 0x10d   :  { %v548_v18 = vadd.f32 %v960_v15, %v508_v14 }
 0x111   :  { %v627_v19 = vpop.f32.mrb[4].mxu1 }
 0x112   :  { %v1006_v20 = vpop.f32.mrb[5].mxu1 }
 0x113   :  { %v630_v21 = vpop.f32.mrb[6].mxu1 }
 0x114   :  { %v1007_v22 = vpop.f32.mrb[7].mxu1 }
 0x127   :  { %v980_v23 = vpop.f32.mrb[4].mxu0 }
 0x128   :  { %v981_v24 = vpop.f32.mrb[5].mxu0 }
 0x129   :  { %v982_v25 = vadd.f32 %v981_v24, %v980_v23  ;;  %v983_v26 = vpop.f32.mrb[6].mxu0 }
 0x12a   :  { %v984_v27 = vpop.f32.mrb[7].mxu0 }
 0x12b   :  { %v588_v28 = vadd.f32 %v982_v25, %v548_v18 }
 0x12d   :  { %v628_v29 = vadd.f32 %v627_v19, %v588_v28 }
 0x12f   :  { %v633_v30 = vmax.f32 %v628_v29, 0.0 }
 0x131   :  { %v634_v31 = vpack.c.bf16 %v633_v30, %v633_v30 }
 0x133   :  { %1025 = vmatmul.mubr.bf16.vlgmr.msra.gmra.mrb[8].mxu1 %v634_v31 }
 0x206   :  { %v740_v35 = vpop.f32.mrb[8].mxu1 }
 0x207   :  { %v741_v36 = vadd.f32 %v905_v34, %v740_v35  ;;  %v1026_v37 = vpop.f32.mrb[9].mxu1 }
 0x208   :  { %v743_v38 = vpop.f32.mrb[10].mxu1 }
 0x209   :  { %v746_v39 = vmax.f32 %v741_v36, 0.0  ;;  %v1027_v40 = vpop.f32.mrb[11].mxu1 }
 0x20b   :  { %v747_v41 = vpack.c.bf16 %v746_v39, %v746_v39 }
 0x20d   :  { %1037 = vmatmul.mubr.msk.bf16.vlgmr.msra.gmra.mrb[8].mxu0 %vm787_vm2, %v747_v41 }
 0x2e0   :  { %v825_v43 = vpop.f32.mrb[8].mxu0 }
 0x2e1   :  { %v826_v44 = vadd.f32 %v914_v42, %v825_v43  ;;  %v1038_v45 = vpop.f32.mrb[9].mxu0 }
 0x2e2   :  { %v828_v46 = vpop.f32.mrb[10].mxu0 }
 0x2e3   :  { %831 = vst [vmem:[#allocation5] sm:$0xff] %v826_v44  ;;  %v1039_v47 = vpop.f32.mrb[11].mxu0 }
 0x2e4   :  { %1147 = shalt.err (!%p1144_p12)
}
 0x2e5   :  { %s1148_s6 = scalar_lea.hbm %s1315_s7, 128 }
 0x2e6   :  { %p1149_p13 = scmp.ne.s32.totalorder %s1315_s7, %s1148_s6  ;;  %p1152_p0 = scmp.lt.u32.totalorder %s1148_s6, %s1315_s7 }
 0x2e8   :  { %p1154_p1 = pnand %p1152_p0, %p1149_p13 }
 0x2ea   :  { %1157 = shalt.err (!%p1154_p1)
}
 0x2eb   :  { %841 = dma.vmem_to_hbm [thread:$0]  %s839_s5, 128, %s1315_s7, [#allocation4]  }
 0x2ec   :  { %1160 = dma.done.wait [#allocation4], 128  }
 0x2ed   :  { %1161 = vsyncadd [#allocation4], 4294967168 }
 0x2ee   :  { %845 = vsyncpa [#allocation3], 1 }
 0x2ef   :  { %846 = vsyncpa [#allocation4], 1 }

</bundles_post_ra>
